<compile_context>
chip_gen: v5e
topology: v5e:2x2
jax: 0.10.0
libtpu: 0.0.40
codegen_flags: <defaults>
</compile_context>

<pallas_src>
import functools

import jax
import jax.numpy as jnp
from jax.experimental import pallas as pl
from jax.experimental.pallas import tpu as pltpu


def _round_up(x, m):
    return (x + m - 1) // m * m


def block_kernel(x_ref, w1_ref, b1_ref, w2_ref, b2_ref, o_ref):
    # Whole hot path (two MXU matmuls + tanh + residual add) fused in one kernel.
    x = x_ref[...]
    h = jnp.tanh(
        jnp.dot(x, w1_ref[...], preferred_element_type=jnp.float32) + b1_ref[...]
    )
    y = jnp.tanh(
        jnp.dot(h.astype(w2_ref.dtype), w2_ref[...],
                preferred_element_type=jnp.float32) + b2_ref[...]
    )
    o_ref[...] = (y + x.astype(jnp.float32)).astype(o_ref.dtype)


@functools.partial(jax.jit, static_argnames=("tm", "lane"))
def block_forward(x, w1, b1, w2, b2, *, tm=512, lane=128):
    """x: (N, in_N); w1: (in_N, width); b1: (1, width); w2: (width, out_N); b2: (1, out_N).

    Weights are passed pre-transposed as (in, out) so the kernel computes
    y = x @ W + b directly on the MXU.
    """
    N, in_N = x.shape
    width = w1.shape[1]
    out_N = w2.shape[1]
    assert out_N == in_N, "residual connection requires out_N == in_N"

    # ---- lane-dense feature padding (last dim -> multiple of 128) ----
    in_p = _round_up(in_N, lane)
    wid_p = _round_up(width, lane)
    out_p = in_p  # out_N == in_N, so the residual add stays aligned

    # ---- batch tiling: clamp tile for tiny N, zero-pad batch to a multiple ----
    tm_eff = min(tm, _round_up(N, 8))          # keep sublane (8) alignment
    N_pad = _round_up(N, tm_eff)

    # Zero padding keeps semantics exact: padded W rows/cols and padded biases
    # are 0, so padded columns of h and y are tanh(0)=0, and padded x columns
    # are 0, so the residual leaves them 0. Padded rows are sliced off below.
    x_p = jnp.zeros((N_pad, in_p), x.dtype).at[:N, :in_N].set(x)
    w1_p = jnp.zeros((in_p, wid_p), w1.dtype).at[:in_N, :width].set(w1)
    b1_p = jnp.zeros((1, wid_p), b1.dtype).at[:, :width].set(b1)
    w2_p = jnp.zeros((wid_p, out_p), w2.dtype).at[:width, :out_N].set(w2)
    b2_p = jnp.zeros((1, out_p), b2.dtype).at[:, :out_N].set(b2)

    grid = (N_pad // tm_eff,)

    out_padded = pl.pallas_call(
        block_kernel,
        out_shape=jax.ShapeDtypeStruct((N_pad, out_p), x.dtype),
        grid_spec=pltpu.PrefetchScalarGridSpec(
            num_scalar_prefetch=0,
            grid=grid,
            in_specs=[
                pl.BlockSpec((tm_eff, in_p), lambda i: (i, 0)),    # x tile
                pl.BlockSpec((in_p, wid_p), lambda i: (0, 0)),     # W1 (resident)
                pl.BlockSpec((1, wid_p), lambda i: (0, 0)),        # b1 (resident)
                pl.BlockSpec((wid_p, out_p), lambda i: (0, 0)),    # W2 (resident)
                pl.BlockSpec((1, out_p), lambda i: (0, 0)),        # b2 (resident)
            ],
            out_specs=pl.BlockSpec((tm_eff, out_p), lambda i: (i, 0)),
        ),
        compiler_params=pltpu.CompilerParams(
            dimension_semantics=("parallel",),   # shards grid across v7x's 2 TCs
        ),
    )(x_p, w1_p, b1_p, w2_p, b2_p)

    # Slice off batch and lane padding.
    return out_padded[:N, :out_N]


def init_linear_params(key, fan_in, fan_out, dtype=jnp.float32):
    """PyTorch-style nn.Linear init: U(-1/sqrt(fan_in), 1/sqrt(fan_in)).
    Weight returned already transposed to (fan_in, fan_out); bias (1, fan_out)."""
    kw, kb = jax.random.split(key)
    bound = 1.0 / jnp.sqrt(fan_in)
    w = jax.random.uniform(kw, (fan_in, fan_out), dtype, -bound, bound)
    b = jax.random.uniform(kb, (1, fan_out), dtype, -bound, bound)
    return w, b


if __name__ == "__main__":
    # Small shapes consistent with the module: Block(in_N=32, width=32, out_N=32).
    # N=200 is deliberately NOT a multiple of the tile to exercise batch padding,
    # and tm=128 gives a 2-step grid (so both v7x TensorCores get work).
    N, in_N, width, out_N = 200, 32, 32, 32

    key = jax.random.PRNGKey(0)
    kx, k1, k2 = jax.random.split(key, 3)

    x = jax.random.normal(kx, (N, in_N), jnp.float32)
    w1, b1 = init_linear_params(k1, in_N, width)
    w2, b2 = init_linear_params(k2, width, out_N)

    out = block_forward(x, w1, b1, w2, b2, tm=128)
    out = jax.block_until_ready(out)

    # Pure-JAX reference check of the forward semantics.
    ref = jnp.tanh(jnp.tanh(x @ w1 + b1) @ w2 + b2) + x
    assert out.shape == (N, out_N)
    assert jnp.allclose(out, ref, atol=1e-5, rtol=1e-5), "mismatch vs reference"

    # Also check the default (large-tile) path at a tiny batch.
    out_small = jax.block_until_ready(block_forward(x[:8], w1, b1, w2, b2))
    assert jnp.allclose(out_small, ref[:8], atol=1e-5, rtol=1e-5), "mismatch (small N)"

    print("KERNEL_OK")
</pallas_src>

<mosaic_0001>
module attributes {stable_mosaic.version = 11 : i64} {
  func.func @block_kernel(%arg0: i32, %arg1: memref<128x128xf32, #tpu.memory_space<vmem>>, %arg2: memref<128x128xf32, #tpu.memory_space<vmem>>, %arg3: memref<1x128xf32, #tpu.memory_space<vmem>>, %arg4: memref<128x128xf32, #tpu.memory_space<vmem>>, %arg5: memref<1x128xf32, #tpu.memory_space<vmem>>, %arg6: memref<128x128xf32, #tpu.memory_space<vmem>>) attributes {dimension_semantics = [#tpu.dimension_semantics<parallel>], iteration_bounds = array<i64: 2>, scalar_prefetch = 0 : i64, scratch_operands = 0 : i64, tpu.core_type = #tpu.core_type<tc>, window_params = [{transform_indices = @transform_0, window_bounds = array<i64: 128, 128>}, {pipeline_mode = #tpu.pipeline_mode<synchronous>, transform_indices = @transform_1, window_bounds = array<i64: 128, 128>}, {pipeline_mode = #tpu.pipeline_mode<synchronous>, transform_indices = @transform_2, window_bounds = array<i64: 1, 128>}, {pipeline_mode = #tpu.pipeline_mode<synchronous>, transform_indices = @transform_3, window_bounds = array<i64: 128, 128>}, {pipeline_mode = #tpu.pipeline_mode<synchronous>, transform_indices = @transform_4, window_bounds = array<i64: 1, 128>}, {transform_indices = @transform_5, window_bounds = array<i64: 128, 128>}]} {
    %c0 = arith.constant 0 : index
    %c0_0 = arith.constant 0 : index
    %0 = vector.load %arg1[%c0, %c0_0] : memref<128x128xf32, #tpu.memory_space<vmem>>, vector<128x128xf32>
    %c0_1 = arith.constant 0 : index
    %c0_2 = arith.constant 0 : index
    %1 = vector.load %arg2[%c0_1, %c0_2] : memref<128x128xf32, #tpu.memory_space<vmem>>, vector<128x128xf32>
    %cst = arith.constant dense<0.000000e+00> : vector<128x128xf32>
    %2 = tpu.matmul %0, %1, %cst {dimension_numbers = #tpu.dot_dimension_numbers<[1], [0], [0], [1], [0, 0, 1, 1], [], []>} : vector<128x128xf32>, vector<128x128xf32>, vector<128x128xf32> -> vector<128x128xf32>
    %c0_3 = arith.constant 0 : index
    %c0_4 = arith.constant 0 : index
    %3 = vector.load %arg3[%c0_3, %c0_4] : memref<1x128xf32, #tpu.memory_space<vmem>>, vector<1x128xf32>
    %4 = vector.broadcast %3 : vector<1x128xf32> to vector<128x128xf32>
    %5 = arith.addf %2, %4 : vector<128x128xf32>
    %6 = math.tanh %5 : vector<128x128xf32>
    %c0_5 = arith.constant 0 : index
    %c0_6 = arith.constant 0 : index
    %7 = vector.load %arg4[%c0_5, %c0_6] : memref<128x128xf32, #tpu.memory_space<vmem>>, vector<128x128xf32>
    %cst_7 = arith.constant dense<0.000000e+00> : vector<128x128xf32>
    %8 = tpu.matmul %6, %7, %cst_7 {dimension_numbers = #tpu.dot_dimension_numbers<[1], [0], [0], [1], [0, 0, 1, 1], [], []>} : vector<128x128xf32>, vector<128x128xf32>, vector<128x128xf32> -> vector<128x128xf32>
    %c0_8 = arith.constant 0 : index
    %c0_9 = arith.constant 0 : index
    %9 = vector.load %arg5[%c0_8, %c0_9] : memref<1x128xf32, #tpu.memory_space<vmem>>, vector<1x128xf32>
    %10 = vector.broadcast %9 : vector<1x128xf32> to vector<128x128xf32>
    %11 = arith.addf %8, %10 : vector<128x128xf32>
    %12 = math.tanh %11 : vector<128x128xf32>
    %13 = arith.addf %12, %0 : vector<128x128xf32>
    %c0_10 = arith.constant 0 : index
    %c0_11 = arith.constant 0 : index
    %14 = vector.load %arg6[%c0_10, %c0_11] : memref<128x128xf32, #tpu.memory_space<vmem>>, vector<128x128xf32>
    tpu.vector_store %arg6[%c0_10, %c0_11], %13 {strides = array<i32>} : memref<128x128xf32, #tpu.memory_space<vmem>>, vector<128x128xf32>,
    return
  }
  func.func @transform_0(%arg0: i32) -> (i32, i32) {
    %c0_i32 = arith.constant 0 : i32
    %c0_i32_0 = arith.constant 0 : i32
    return %arg0, %c0_i32 : i32, i32
  }
  func.func @transform_1(%arg0: i32) -> (i32, i32) {
    %c0_i32 = arith.constant 0 : i32
    %c0_i32_0 = arith.constant 0 : i32
    %c0_i32_1 = arith.constant 0 : i32
    return %c0_i32, %c0_i32_0 : i32, i32
  }
  func.func @transform_2(%arg0: i32) -> (i32, i32) {
    %c0_i32 = arith.constant 0 : i32
    %c0_i32_0 = arith.constant 0 : i32
    %c0_i32_1 = arith.constant 0 : i32
    return %c0_i32, %c0_i32_0 : i32, i32
  }
  func.func @transform_3(%arg0: i32) -> (i32, i32) {
    %c0_i32 = arith.constant 0 : i32
    %c0_i32_0 = arith.constant 0 : i32
    %c0_i32_1 = arith.constant 0 : i32
    return %c0_i32, %c0_i32_0 : i32, i32
  }
  func.func @transform_4(%arg0: i32) -> (i32, i32) {
    %c0_i32 = arith.constant 0 : i32
    %c0_i32_0 = arith.constant 0 : i32
    %c0_i32_1 = arith.constant 0 : i32
    return %c0_i32, %c0_i32_0 : i32, i32
  }
  func.func @transform_5(%arg0: i32) -> (i32, i32) {
    %c0_i32 = arith.constant 0 : i32
    %c0_i32_0 = arith.constant 0 : i32
    return %arg0, %c0_i32 : i32, i32
  }
}

</mosaic_0001>

<bundles_post_ra>
// kernel: block_forward.1
= control target key start
LH: loop header
LB: loop body
LE: loop exit
PB: predicated region body
PF: predicated region fallthrough
CT: control target
= control target key end

     0   :  { %s689_s18 = smov 0   ;;  %s951_s0 = inlined_call_operand.vmem [shape: f32[256,128], index: 0, kind: input, shape index: {}]   ;;  %s952_s1 = inlined_call_operand.vmem [shape: f32[128,128], index: 1, kind: input, shape index: {}]   ;;  %s953_s2 = inlined_call_operand.vmem [shape: f32[1,128], index: 2, kind: input, shape index: {}]   ;;  %s954_s3 = inlined_call_operand.vmem [shape: f32[128,128], index: 3, kind: input, shape index: {}]   ;;  %s955_s4 = inlined_call_operand.vmem [shape: f32[1,128], index: 4, kind: input, shape index: {}]   ;;  %s956_s5 = inlined_call_operand.vmem [shape: f32[256,128], index: 5, kind: output, shape index: {}]  }
   0x1 LB: > { %s534_s19 = sadd.s32 4294967295, %s657_s18   ;;  %p538_p0 = scmp.ge.s32.totalorder %s657_s18, 1  ;;  %s657_s18 = sphi %s689_s18, %s15_s18  }
   0x2   : > { %p188_p1 = scmp.lt.s32.totalorder %s657_s18, 3 }
   0x4   : > { %p189_p2 = pnand %p538_p0, %p188_p1 }
   0x5   : > { %s539_s11 = sshll.u32 (!%p189_p2), %s534_s19, 4 }
   0x6   : > { %192 = sbr.rel (%p189_p2) target bundleno = 384 (0x180), region = 40  ;;  %p217_p3 = scmp.lt.s32.totalorder (!%p189_p2), %s539_s11, 31 }
   0xb   : > { %v259_v0 = vld [vmem:[%s952_s1 + $0x78] sm:$0xff]  ;;  %v258_v1 = vld [vmem:[%s952_s1 + $0x70] sm:$0xff]  ;;  %v257_v2 = vld [vmem:[%s952_s1 + $0x68] sm:$0xff]  ;;  %s958_s11 = smov (!%p217_p3, %s539_s11), 31 }
   0xc   : > { %545 = vmatpush.msra.mxu2 %v259_v0  ;;  %264 = vmatpush.msra.mxu0 %v259_v0  ;;  %v256_v3 = vld [vmem:[%s952_s1 + $0x60] sm:$0xff]  ;;  %v255_v4 = vld [vmem:[%s952_s1 + $0x58] sm:$0xff]  ;;  %v254_v5 = vld [vmem:[%s952_s1 + $0x50] sm:$0xff]  ;;  %s540_s23 = sshll.u32 %s958_s11, 3 }
   0xd   : > { %v253_v6 = vld [vmem:[%s952_s1 + $0x48] sm:$0xff]  ;;  %v252_v7 = vld [vmem:[%s952_s1 + $0x40] sm:$0xff]  ;;  %v251_v8 = vld [vmem:[%s952_s1 + $0x38] sm:$0xff]  ;;  %s750_s30 = scalar_lea.vmem %s951_s0, %s540_s23  ;;  %s899_s27 = scalar_lea.vmem %s956_s5, %s540_s23 }
   0xe   : > { %546 = vmatpush.msra.mxu2 %v258_v1  ;;  %265 = vmatpush.msra.mxu0 %v258_v1  ;;  %v250_v9 = vld [vmem:[%s952_s1 + $0x30] sm:$0xff]  ;;  %v249_v10 = vld [vmem:[%s952_s1 + $0x28] sm:$0xff]  ;;  %v248_v11 = vld [vmem:[%s952_s1 + $0x20] sm:$0xff] }
   0xf   : > { %v247_v12 = vld [vmem:[%s952_s1 + $0x18] sm:$0xff]  ;;  %v246_v13 = vld [vmem:[%s952_s1 + $0x10] sm:$0xff]  ;;  %v245_v14 = vld [vmem:[%s952_s1 + $0x8] sm:$0xff] }
  0x10   : > { %547 = vmatpush.msra.mxu2 %v257_v2  ;;  %266 = vmatpush.msra.mxu0 %v257_v2  ;;  %v244_v15 = vld [vmem:[%s952_s1] sm:$0xff]  ;;  %v764_v18 = vld [vmem:[%s750_s30 + $0x48] sm:$0xff]  ;;  %v772_v20 = vld [vmem:[%s750_s30 + $0x50] sm:$0xff] }
  0x11   : > { %v756_v16 = vld [vmem:[%s750_s30 + $0x40] sm:$0xff]  ;;  %v767_v19 = vld [vmem:[%s750_s30 + $0x8] sm:$0xff]  ;;  %v775_v21 = vld [vmem:[%s750_s30 + $0x10] sm:$0xff] }
  0x12   : > { %548 = vmatpush.msra.mxu2 %v256_v3  ;;  %267 = vmatpush.msra.mxu0 %v256_v3  ;;  %v759_v17 = vld [vmem:[%s750_s30] sm:$0xff]  ;;  %v780_v22 = vld [vmem:[%s750_s30 + $0x58] sm:$0xff]  ;;  %v359_v25 = vld [vmem:[%s954_s3 + $0x70] sm:$0xff] }
  0x13   : > { %v783_v23 = vld [vmem:[%s750_s30 + $0x18] sm:$0xff]  ;;  %v358_v26 = vld [vmem:[%s954_s3 + $0x68] sm:$0xff]  ;;  %v357_v27 = vld [vmem:[%s954_s3 + $0x60] sm:$0xff] }
  0x14   : > { %549 = vmatpush.msra.mxu2 %v255_v4  ;;  %268 = vmatpush.msra.mxu0 %v255_v4  ;;  %v360_v24 = vld [vmem:[%s954_s3 + $0x78] sm:$0xff]  ;;  %v800_v28 = vld [vmem:[%s750_s30 + $0x60] sm:$0xff]  ;;  %v355_v31 = vld [vmem:[%s954_s3 + $0x50] sm:$0xff] }
  0x15   : > { %561 = vmatpush.msra.mxu3 %v360_v24  ;;  %365 = vmatpush.msra.mxu1 %v360_v24  ;;  %v803_v29 = vld [vmem:[%s750_s30 + $0x20] sm:$0xff]  ;;  %v356_v30 = vld [vmem:[%s954_s3 + $0x58] sm:$0xff]  ;;  %v354_v32 = vld [vmem:[%s954_s3 + $0x48] sm:$0xff] }
  0x16   : > { %550 = vmatpush.msra.mxu2 %v254_v5  ;;  %269 = vmatpush.msra.mxu0 %v254_v5  ;;  %v353_v33 = vld [vmem:[%s954_s3 + $0x40] sm:$0xff]  ;;  %v820_v34 = vld [vmem:[%s750_s30 + $0x68] sm:$0xff]  ;;  %v352_v36 = vld [vmem:[%s954_s3 + $0x38] sm:$0xff] }
  0x17   : > { %562 = vmatpush.msra.mxu3 %v359_v25  ;;  %366 = vmatpush.msra.mxu1 %v359_v25  ;;  %v823_v35 = vld [vmem:[%s750_s30 + $0x28] sm:$0xff]  ;;  %v351_v37 = vld [vmem:[%s954_s3 + $0x30] sm:$0xff]  ;;  %v845_v41 = vld [vmem:[%s750_s30 + $0x78] sm:$0xff] }
  0x18   : > { %551 = vmatpush.msra.mxu2 %v253_v6  ;;  %270 = vmatpush.msra.mxu0 %v253_v6  ;;  %v350_v38 = vld [vmem:[%s954_s3 + $0x28] sm:$0xff]  ;;  %v837_v39 = vld [vmem:[%s750_s30 + $0x70] sm:$0xff]  ;;  %v848_v42 = vld [vmem:[%s750_s30 + $0x38] sm:$0xff] }
  0x19   : > { %563 = vmatpush.msra.mxu3 %v358_v26  ;;  %367 = vmatpush.msra.mxu1 %v358_v26  ;;  %v840_v40 = vld [vmem:[%s750_s30 + $0x30] sm:$0xff]  ;;  %v349_v43 = vld [vmem:[%s954_s3 + $0x20] sm:$0xff]  ;;  %v348_v44 = vld [vmem:[%s954_s3 + $0x18] sm:$0xff] }
  0x1a   : > { %552 = vmatpush.msra.mxu2 %v252_v7  ;;  %271 = vmatpush.msra.mxu0 %v252_v7  ;;  %v347_v45 = vld [vmem:[%s954_s3 + $0x10] sm:$0xff]  ;;  %v346_v46 = vld [vmem:[%s954_s3 + $0x8] sm:$0xff]  ;;  %v345_v47 = vld [vmem:[%s954_s3] sm:$0xff] }
  0x1b   : > { %564 = vmatpush.msra.mxu3 %v357_v27  ;;  %368 = vmatpush.msra.mxu1 %v357_v27  ;;  %v870_v48 = vld [vmem:[%s953_s2] ss:$0 sm:$0xff] }
  0x1c   : > { %553 = vmatpush.msra.mxu2 %v251_v8  ;;  %272 = vmatpush.msra.mxu0 %v251_v8 }
  0x1d   : > { %565 = vmatpush.msra.mxu3 %v356_v30  ;;  %369 = vmatpush.msra.mxu1 %v356_v30 }
  0x1e   : > { %554 = vmatpush.msra.mxu2 %v250_v9  ;;  %273 = vmatpush.msra.mxu0 %v250_v9 }
  0x1f   : > { %566 = vmatpush.msra.mxu3 %v355_v31  ;;  %370 = vmatpush.msra.mxu1 %v355_v31 }
  0x20   : > { %555 = vmatpush.msra.mxu2 %v249_v10  ;;  %274 = vmatpush.msra.mxu0 %v249_v10 }
  0x21   : > { %567 = vmatpush.msra.mxu3 %v354_v32  ;;  %371 = vmatpush.msra.mxu1 %v354_v32 }
  0x22   : > { %556 = vmatpush.msra.mxu2 %v248_v11  ;;  %275 = vmatpush.msra.mxu0 %v248_v11 }
  0x23   : > { %568 = vmatpush.msra.mxu3 %v353_v33  ;;  %372 = vmatpush.msra.mxu1 %v353_v33 }
  0x24   : > { %557 = vmatpush.msra.mxu2 %v247_v12  ;;  %276 = vmatpush.msra.mxu0 %v247_v12 }
  0x25   : > { %569 = vmatpush.msra.mxu3 %v352_v36  ;;  %373 = vmatpush.msra.mxu1 %v352_v36 }
  0x26   : > { %558 = vmatpush.msra.mxu2 %v246_v13  ;;  %277 = vmatpush.msra.mxu0 %v246_v13 }
  0x27   : > { %570 = vmatpush.msra.mxu3 %v351_v37  ;;  %374 = vmatpush.msra.mxu1 %v351_v37 }
  0x28   : > { %559 = vmatpush.msra.mxu2 %v245_v14  ;;  %278 = vmatpush.msra.mxu0 %v245_v14 }
  0x29   : > { %571 = vmatpush.msra.mxu3 %v350_v38  ;;  %375 = vmatpush.msra.mxu1 %v350_v38 }
  0x2a   : > { %560 = vmatpush.msra.mxu2 %v244_v15  ;;  %279 = vmatpush.msra.mxu0 %v244_v15 }
  0x2b   : > { %304 = vmatmul.f32.vlgmr.msra.gmra.mxu2 %v756_v16  ;;  %280 = vmatmul.f32.vlgmr.msra.gmra.mxu0 %v759_v17 }
  0x2c   : > { %572 = vmatpush.msra.mxu3 %v349_v43  ;;  %376 = vmatpush.msra.mxu1 %v349_v43 }
  0x2e   : > { %573 = vmatpush.msra.mxu3 %v348_v44  ;;  %377 = vmatpush.msra.mxu1 %v348_v44 }
  0x30   : > { %574 = vmatpush.msra.mxu3 %v347_v45  ;;  %378 = vmatpush.msra.mxu1 %v347_v45 }
  0x32   : > { %575 = vmatpush.msra.mxu3 %v346_v46  ;;  %379 = vmatpush.msra.mxu1 %v346_v46 }
  0x33   : > { %307 = vmatmul.f32.gmra.mxu2 %v764_v18  ;;  %283 = vmatmul.f32.gmra.mxu0 %v767_v19 }
  0x34   : > { %576 = vmatpush.msra.mxu3 %v345_v47  ;;  %380 = vmatpush.msra.mxu1 %v345_v47 }
  0x3b   : > { %310 = vmatmul.f32.gmra.mxu2 %v772_v20  ;;  %286 = vmatmul.f32.gmra.mxu0 %v775_v21 }
  0x43   : > { %313 = vmatmul.f32.gmra.mxu2 %v780_v22  ;;  %289 = vmatmul.f32.gmra.mxu0 %v783_v23 }
  0x4b   : > { %316 = vmatmul.f32.gmra.mxu2 %v800_v28  ;;  %292 = vmatmul.f32.gmra.mxu0 %v803_v29 }
  0x53   : > { %319 = vmatmul.f32.gmra.mxu2 %v820_v34  ;;  %295 = vmatmul.f32.gmra.mxu0 %v823_v35 }
  0x5b   : > { %322 = vmatmul.f32.gmra.mxu2 %v837_v39  ;;  %298 = vmatmul.f32.gmra.mxu0 %v840_v40 }
  0x63   : > { %325 = vmatmul.f32.gmra.mxu2 %v845_v41  ;;  %301 = vmatmul.f32.gmra.mxu0 %v848_v42 }
  0xa8   : > { %v281_v49 = vpop.f32.mrf.mxu0 }
  0xa9   : > { %v282_v50 = vadd.f32 %v870_v48, %v281_v49 }
  0xab   : > { %587 = vtanh.f32 %v282_v50  ;;  %v891_v50 = vld [vmem:[%s955_s4] ss:$0 sm:$0xff] }
  0xae   : > { %v305_v51 = vpop.f32.mrf.mxu2 }
  0xaf   : > { %v306_v52 = vadd.f32 %v870_v48, %v305_v51 }
  0xb0   : > { %v284_v53 = vpop.f32.mrf.mxu0 }
  0xb1   : > { %v588_v54 = vpop.eup %587  ;;  %589 = vtanh.f32 %v306_v52  ;;  %v285_v55 = vadd.f32 %v870_v48, %v284_v53 }
  0xb2   : > { %381 = vmatmul.f32.vlgmr.msra.gmra.mxu1 %v588_v54 }
  0xb3   : > { %591 = vtanh.f32 %v285_v55 }
  0xb6   : > { %v308_v56 = vpop.f32.mrf.mxu2 }
  0xb7   : > { %v590_v57 = vpop.eup %589  ;;  %v309_v58 = vadd.f32 %v870_v48, %v308_v56 }
  0xb8   : > { %405 = vmatmul.f32.vlgmr.msra.gmra.mxu3 %v590_v57  ;;  %v287_v59 = vpop.f32.mrf.mxu0 }
  0xb9   : > { %v592_v60 = vpop.eup %591  ;;  %593 = vtanh.f32 %v309_v58  ;;  %v288_v61 = vadd.f32 %v870_v48, %v287_v59 }
  0xba   : > { %384 = vmatmul.f32.gmra.mxu1 %v592_v60 }
  0xbb   : > { %595 = vtanh.f32 %v288_v61 }
  0xbe   : > { %v311_v62 = vpop.f32.mrf.mxu2 }
  0xbf   : > { %v594_v63 = vpop.eup %593  ;;  %v312_v0 = vadd.f32 %v870_v48, %v311_v62 }
  0xc0   : > { %408 = vmatmul.f32.gmra.mxu3 %v594_v63  ;;  %v290_v1 = vpop.f32.mrf.mxu0 }
  0xc1   : > { %v596_v2 = vpop.eup %595  ;;  %597 = vtanh.f32 %v312_v0  ;;  %v291_v3 = vadd.f32 %v870_v48, %v290_v1 }
  0xc2   : > { %387 = vmatmul.f32.gmra.mxu1 %v596_v2 }
  0xc3   : > { %599 = vtanh.f32 %v291_v3 }
  0xc6   : > { %v314_v4 = vpop.f32.mrf.mxu2 }
  0xc7   : > { %v598_v5 = vpop.eup %597  ;;  %v315_v6 = vadd.f32 %v870_v48, %v314_v4 }
  0xc8   : > { %411 = vmatmul.f32.gmra.mxu3 %v598_v5  ;;  %v293_v7 = vpop.f32.mrf.mxu0 }
  0xc9   : > { %v600_v8 = vpop.eup %599  ;;  %601 = vtanh.f32 %v315_v6  ;;  %v294_v9 = vadd.f32 %v870_v48, %v293_v7 }
  0xca   : > { %390 = vmatmul.f32.gmra.mxu1 %v600_v8 }
  0xcb   : > { %603 = vtanh.f32 %v294_v9 }
  0xce   : > { %v317_v10 = vpop.f32.mrf.mxu2 }
  0xcf   : > { %v602_v11 = vpop.eup %601  ;;  %v318_v12 = vadd.f32 %v870_v48, %v317_v10 }
  0xd0   : > { %414 = vmatmul.f32.gmra.mxu3 %v602_v11  ;;  %v296_v13 = vpop.f32.mrf.mxu0 }
  0xd1   : > { %v604_v14 = vpop.eup %603  ;;  %605 = vtanh.f32 %v318_v12  ;;  %v297_v15 = vadd.f32 %v870_v48, %v296_v13 }
  0xd2   : > { %393 = vmatmul.f32.gmra.mxu1 %v604_v14 }
  0xd3   : > { %607 = vtanh.f32 %v297_v15 }
  0xd6   : > { %v320_v24 = vpop.f32.mrf.mxu2 }
  0xd7   : > { %v606_v25 = vpop.eup %605  ;;  %v321_v26 = vadd.f32 %v870_v48, %v320_v24 }
  0xd8   : > { %417 = vmatmul.f32.gmra.mxu3 %v606_v25  ;;  %v299_v27 = vpop.f32.mrf.mxu0 }
  0xd9   : > { %v608_v30 = vpop.eup %607  ;;  %609 = vtanh.f32 %v321_v26  ;;  %v300_v31 = vadd.f32 %v870_v48, %v299_v27 }
  0xda   : > { %396 = vmatmul.f32.gmra.mxu1 %v608_v30 }
  0xdb   : > { %611 = vtanh.f32 %v300_v31 }
  0xde   : > { %v323_v32 = vpop.f32.mrf.mxu2 }
  0xdf   : > { %v610_v33 = vpop.eup %609  ;;  %v324_v36 = vadd.f32 %v870_v48, %v323_v32 }
  0xe0   : > { %420 = vmatmul.f32.gmra.mxu3 %v610_v33  ;;  %v302_v37 = vpop.f32.mrf.mxu0 }
  0xe1   : > { %v612_v38 = vpop.eup %611  ;;  %613 = vtanh.f32 %v324_v36  ;;  %v303_v43 = vadd.f32 %v870_v48, %v302_v37 }
  0xe2   : > { %399 = vmatmul.f32.gmra.mxu1 %v612_v38 }
  0xe3   : > { %615 = vtanh.f32 %v303_v43 }
  0xe6   : > { %v326_v44 = vpop.f32.mrf.mxu2 }
  0xe7   : > { %v614_v45 = vpop.eup %613  ;;  %v327_v46 = vadd.f32 %v870_v48, %v326_v44 }
  0xe8   : > { %423 = vmatmul.f32.gmra.mxu3 %v614_v45 }
  0xe9   : > { %v616_v47 = vpop.eup %615  ;;  %617 = vtanh.f32 %v327_v46 }
  0xea   : > { %402 = vmatmul.f32.gmra.mxu1 %v616_v47 }
  0xef   : > { %v618_v49 = vpop.eup %617 }
  0xf0   : > { %426 = vmatmul.f32.gmra.mxu3 %v618_v49 }
 0x12f   : > { %v382_v51 = vpop.f32.mrf.mxu1 }
 0x130   : > { %v383_v52 = vadd.f32 %v891_v50, %v382_v51 }
 0x132   : > { %619 = vtanh.f32 %v383_v52 }
 0x137   : > { %v385_v53 = vpop.f32.mrf.mxu1 }
 0x138   : > { %v620_v54 = vpop.eup %619  ;;  %v386_v48 = vadd.f32 %v891_v50, %v385_v53 }
 0x139   : > { %v446_v55 = vadd.f32 %v620_v54, %v759_v17 }
 0x13a   : > { %621 = vtanh.f32 %v386_v48 }
 0x13b   : > { %462 = vst [vmem:[%s899_s27] sm:$0xff] %v446_v55  ;;  %v406_v56 = vpop.f32.mrf.mxu3 }
 0x13c   : > { %v407_v57 = vadd.f32 %v891_v50, %v406_v56 }
 0x13e   : > { %623 = vtanh.f32 %v407_v57 }
 0x13f   : > { %v388_v58 = vpop.f32.mrf.mxu1 }
 0x140   : > { %v622_v59 = vpop.eup %621  ;;  %v389_v60 = vadd.f32 %v891_v50, %v388_v58 }
 0x141   : > { %v447_v61 = vadd.f32 %v622_v59, %v767_v19 }
 0x142   : > { %625 = vtanh.f32 %v389_v60 }
 0x143   : > { %463 = vst [vmem:[%s899_s27 + $0x8] sm:$0xff] %v447_v61  ;;  %v409_v62 = vpop.f32.mrf.mxu3 }
 0x144   : > { %v624_v63 = vpop.eup %623  ;;  %v410_v17 = vadd.f32 %v891_v50, %v409_v62 }
 0x145   : > { %v454_v0 = vadd.f32 %v624_v63, %v756_v16 }
 0x146   : > { %627 = vtanh.f32 %v410_v17 }
 0x147   : > { %470 = vst [vmem:[%s899_s27 + $0x40] sm:$0xff] %v454_v0  ;;  %v391_v1 = vpop.f32.mrf.mxu1 }
 0x148   : > { %v626_v2 = vpop.eup %625  ;;  %v392_v3 = vadd.f32 %v891_v50, %v391_v1 }
 0x149   : > { %v448_v4 = vadd.f32 %v626_v2, %v775_v21 }
 0x14a   : > { %629 = vtanh.f32 %v392_v3 }
 0x14b   : > { %464 = vst [vmem:[%s899_s27 + $0x10] sm:$0xff] %v448_v4  ;;  %v412_v19 = vpop.f32.mrf.mxu3 }
 0x14c   : > { %v628_v5 = vpop.eup %627  ;;  %v413_v6 = vadd.f32 %v891_v50, %v412_v19 }
 0x14d   : > { %v455_v7 = vadd.f32 %v628_v5, %v764_v18 }
 0x14e   : > { %631 = vtanh.f32 %v413_v6 }
 0x14f   : > { %471 = vst [vmem:[%s899_s27 + $0x48] sm:$0xff] %v455_v7  ;;  %v394_v16 = vpop.f32.mrf.mxu1 }
 0x150   : > { %v630_v8 = vpop.eup %629  ;;  %v395_v9 = vadd.f32 %v891_v50, %v394_v16 }
 0x151   : > { %v449_v10 = vadd.f32 %v630_v8, %v783_v23 }
 0x152   : > { %633 = vtanh.f32 %v395_v9 }
 0x153   : > { %465 = vst [vmem:[%s899_s27 + $0x18] sm:$0xff] %v449_v10  ;;  %v415_v21 = vpop.f32.mrf.mxu3 }
 0x154   : > { %v632_v11 = vpop.eup %631  ;;  %v416_v12 = vadd.f32 %v891_v50, %v415_v21 }
 0x155   : > { %v456_v13 = vadd.f32 %v632_v11, %v772_v20 }
 0x156   : > { %635 = vtanh.f32 %v416_v12 }
 0x157   : > { %472 = vst [vmem:[%s899_s27 + $0x50] sm:$0xff] %v456_v13  ;;  %v397_v18 = vpop.f32.mrf.mxu1 }
 0x158   : > { %v634_v14 = vpop.eup %633  ;;  %v398_v15 = vadd.f32 %v891_v50, %v397_v18 }
 0x159   : > { %v450_v24 = vadd.f32 %v634_v14, %v803_v29 }
 0x15a   : > { %637 = vtanh.f32 %v398_v15 }
 0x15b   : > { %466 = vst [vmem:[%s899_s27 + $0x20] sm:$0xff] %v450_v24  ;;  %v418_v23 = vpop.f32.mrf.mxu3 }
 0x15c   : > { %v636_v25 = vpop.eup %635  ;;  %v419_v26 = vadd.f32 %v891_v50, %v418_v23 }
 0x15d   : > { %v457_v27 = vadd.f32 %v636_v25, %v780_v22 }
 0x15e   : > { %639 = vtanh.f32 %v419_v26 }
 0x15f   : > { %473 = vst [vmem:[%s899_s27 + $0x58] sm:$0xff] %v457_v27  ;;  %v400_v20 = vpop.f32.mrf.mxu1 }
 0x160   : > { %v638_v30 = vpop.eup %637  ;;  %v401_v31 = vadd.f32 %v891_v50, %v400_v20 }
 0x161   : > { %v451_v32 = vadd.f32 %v638_v30, %v823_v35 }
 0x162   : > { %641 = vtanh.f32 %v401_v31 }
 0x163   : > { %467 = vst [vmem:[%s899_s27 + $0x28] sm:$0xff] %v451_v32  ;;  %v421_v29 = vpop.f32.mrf.mxu3 }
 0x164   : > { %v640_v33 = vpop.eup %639  ;;  %v422_v36 = vadd.f32 %v891_v50, %v421_v29 }
 0x165   : > { %v458_v37 = vadd.f32 %v640_v33, %v800_v28 }
 0x166   : > { %643 = vtanh.f32 %v422_v36 }
 0x167   : > { %474 = vst [vmem:[%s899_s27 + $0x60] sm:$0xff] %v458_v37  ;;  %v403_v22 = vpop.f32.mrf.mxu1 }
 0x168   : > { %v642_v38 = vpop.eup %641  ;;  %v404_v43 = vadd.f32 %v891_v50, %v403_v22 }
 0x169   : > { %v452_v44 = vadd.f32 %v642_v38, %v840_v40 }
 0x16a   : > { %645 = vtanh.f32 %v404_v43 }
 0x16b   : > { %468 = vst [vmem:[%s899_s27 + $0x30] sm:$0xff] %v452_v44  ;;  %v424_v35 = vpop.f32.mrf.mxu3 }
 0x16c   : > { %v644_v45 = vpop.eup %643  ;;  %v425_v46 = vadd.f32 %v891_v50, %v424_v35 }
 0x16d   : > { %v459_v47 = vadd.f32 %v644_v45, %v820_v34 }
 0x16e   : > { %647 = vtanh.f32 %v425_v46 }
 0x16f   : > { %475 = vst [vmem:[%s899_s27 + $0x68] sm:$0xff] %v459_v47 }
 0x170   : > { %v646_v28 = vpop.eup %645 }
 0x171   : > { %v453_v49 = vadd.f32 %v646_v28, %v848_v42 }
 0x173   : > { %469 = vst [vmem:[%s899_s27 + $0x38] sm:$0xff] %v453_v49  ;;  %v427_v51 = vpop.f32.mrf.mxu3 }
 0x174   : > { %v648_v52 = vpop.eup %647  ;;  %v428_v40 = vadd.f32 %v891_v50, %v427_v51 }
 0x175   : > { %v460_v53 = vadd.f32 %v648_v52, %v837_v39 }
 0x176   : > { %649 = vtanh.f32 %v428_v40 }
 0x177   : > { %476 = vst [vmem:[%s899_s27 + $0x70] sm:$0xff] %v460_v53 }
 0x17c   : > { %v650_v54 = vpop.eup %649 }
 0x17d   : > { %v461_v48 = vadd.f32 %v650_v54, %v845_v41 }
 0x17f   : > { %477 = vst [vmem:[%s899_s27 + $0x78] sm:$0xff] %v461_v48 }
 0x180 PF: > { %s15_s18 = sadd.s32 1, %s657_s18  }
 0x181   : > { %p12_p4 = scmp.ge.s32.totalorder %s15_s18, 4  }
 0x183   :  { %14 = sbr.rel (!%p12_p4) target bundleno = 1 (0x1), region = 70 }

</bundles_post_ra>
